<compile_context>
chip_gen: v7x
topology: tpu7x:2x2x1
jax: 0.10.0
libtpu: 0.0.40
codegen_flags: <defaults>
</compile_context>

<pallas_src>
import functools

import jax
import jax.numpy as jnp
from jax.experimental import pallas as pl
from jax.experimental.pallas import tpu as pltpu


# ---------------------------------------------------------------------------
# Kernels
# ---------------------------------------------------------------------------
def _linear_kernel_single_k(x_ref, w_ref, b_ref, o_ref):
    # x_ref: (tm, tk)  w_ref: (tn, tk)  b_ref: (1, tn)  o_ref: (tm, tn)
    # Whole K fits in one tile: no accumulator, no pl.when phases.
    y = jax.lax.dot_general(
        x_ref[...], w_ref[...],
        dimension_numbers=(((1,), (1,)), ((), ())),   # contract K of both
        preferred_element_type=jnp.float32)
    o_ref[...] = (y + b_ref[...].astype(jnp.float32)).astype(o_ref.dtype)


def _linear_kernel_multi_k(x_ref, w_ref, b_ref, o_ref, acc_ref):
    # x_ref: (tm, tk)  w_ref: (tn, tk)  b_ref: (1, tn)
    # o_ref: (tm, tn)  acc_ref: (tm, tn) f32 scratch accumulator
    k = pl.program_id(2)

    @pl.when(k == 0)
    def _init():
        # Seed the accumulator with the (broadcast) bias -> no finalize add.
        acc_ref[...] = jnp.broadcast_to(
            b_ref[...].astype(jnp.float32), acc_ref.shape)

    acc_ref[...] += jax.lax.dot_general(
        x_ref[...], w_ref[...],
        dimension_numbers=(((1,), (1,)), ((), ())),   # native W^T on the MXU
        preferred_element_type=jnp.float32)

    @pl.when(k == pl.num_programs(2) - 1)
    def _finalize():
        o_ref[...] = acc_ref[...].astype(o_ref.dtype)


# ---------------------------------------------------------------------------
# Wrapper
# ---------------------------------------------------------------------------
_SUBLANE_TILE = {
    jnp.dtype(jnp.float32): 8,
    jnp.dtype(jnp.bfloat16): 16,
    jnp.dtype(jnp.float16): 16,
    jnp.dtype(jnp.int8): 32,
    jnp.dtype(jnp.uint8): 32,
}


def _round_up(v, m):
    return (v + m - 1) // m * m


def _balanced_tile(dim, max_tile, align):
    """Largest tile <= max_tile (multiple of `align`) that pads `dim` minimally."""
    dim_r = _round_up(dim, align)
    if dim_r <= max_tile:
        return dim_r
    n_blocks = -(-dim_r // max_tile)                 # cdiv
    return _round_up(-(-dim_r // n_blocks), align)   # balanced block size


@functools.partial(jax.jit, static_argnames=("tm", "tn", "tk"))
def linear_forward(x, weight, bias, *, tm=None, tn=None, tk=None):
    """y = x @ weight.T + bias  (torch.nn.Linear semantics).

    x: (M, K)   weight: (N, K)   bias: (N,)   ->   y: (M, N)
    """
    M, K = x.shape
    N, K2 = weight.shape
    assert K == K2, "weight must be (out_features, in_features)"

    sub = _SUBLANE_TILE.get(jnp.dtype(x.dtype), 8)

    # Tile budgets: 512x512x1024 default (AI ~128 FLOP/byte f32, MXU-bound on
    # all generations, ~11 MiB VMEM -> safe on v7x's 64 MiB).  Light skew
    # heuristic: favor fewer i-blocks for weight-heavy shapes (W re-read
    # Mp/tm times) and fewer j-blocks for activation-heavy shapes.
    tm_max = tm if tm is not None else (1024 if (M > 512 and N >= 2 * M) else 512)
    tn_max = tn if tn is not None else (1024 if (N > 512 and M >= 2 * N) else 512)
    tk_max = tk if tk is not None else 1024

    TM = _balanced_tile(M, tm_max, sub)
    TN = _balanced_tile(N, tn_max, 128)
    TK = _balanced_tile(K, tk_max, 128)

    Mp, Np, Kp = _round_up(M, TM), _round_up(N, TN), _round_up(K, TK)

    # Zero-pad only when needed; balanced tiles keep the padding minimal.
    x_p = x if (Mp == M and Kp == K) else jnp.pad(x, ((0, Mp - M), (0, Kp - K)))
    w_p = weight if (Np == N and Kp == K) else jnp.pad(weight,
                                                       ((0, Np - N), (0, Kp - K)))
    b_p = bias if Np == N else jnp.pad(bias, (0, Np - N))
    b2d = b_p.reshape(1, Np)

    grid_m, grid_n, grid_k = Mp // TM, Np // TN, Kp // TK

    x_bytes = jnp.dtype(x.dtype).itemsize
    w_bytes = jnp.dtype(weight.dtype).itemsize
    b_bytes = jnp.dtype(bias.dtype).itemsize
    o_bytes = x_bytes

    # Double-buffered in/out tiles (+ f32 accumulator in the multi-K path).
    footprint = 2 * (TM * TK * x_bytes + TN * TK * w_bytes
                     + TN * b_bytes + TM * TN * o_bytes)
    if grid_k > 1:
        footprint += TM * TN * 4
    vmem_limit = int(min(max(footprint * 3 // 2 + (2 << 20), 16 << 20), 64 << 20))

    # Truthful traffic estimate: x re-read per j-block, W/bias per i-block.
    bytes_accessed = (x_p.size * x_bytes * grid_n
                      + w_p.size * w_bytes * grid_m
                      + b2d.size * b_bytes * grid_m
                      + Mp * Np * o_bytes)

    if grid_k == 1:
        grid = (grid_m, grid_n)
        in_specs = [
            pl.BlockSpec((TM, TK), lambda i, j: (i, 0)),   # x tile
            pl.BlockSpec((TN, TK), lambda i, j: (j, 0)),   # weight tile (N,K)
            pl.BlockSpec((1, TN), lambda i, j: (0, j)),    # bias tile
        ]
        out_specs = pl.BlockSpec((TM, TN), lambda i, j: (i, j))
        scratch_shapes = []
        kernel = _linear_kernel_single_k
        dim_sem = ("parallel", "parallel")
    else:
        grid = (grid_m, grid_n, grid_k)
        in_specs = [
            pl.BlockSpec((TM, TK), lambda i, j, k: (i, k)),   # x tile
            pl.BlockSpec((TN, TK), lambda i, j, k: (j, k)),   # weight tile (N,K)
            pl.BlockSpec((1, TN), lambda i, j, k: (0, j)),    # bias tile
        ]
        out_specs = pl.BlockSpec((TM, TN), lambda i, j, k: (i, j))
        scratch_shapes = [pltpu.VMEM((TM, TN), jnp.float32)]
        kernel = _linear_kernel_multi_k
        dim_sem = ("parallel", "parallel", "arbitrary")

    out = pl.pallas_call(
        kernel,
        out_shape=jax.ShapeDtypeStruct((Mp, Np), x.dtype),
        grid_spec=pltpu.PrefetchScalarGridSpec(
            num_scalar_prefetch=0,
            grid=grid,
            in_specs=in_specs,
            out_specs=out_specs,
            scratch_shapes=scratch_shapes,
        ),
        compiler_params=pltpu.CompilerParams(
            dimension_semantics=dim_sem,
            vmem_limit_bytes=vmem_limit,
        ),
        cost_estimate=pl.CostEstimate(
            flops=2 * Mp * Kp * Np,
            transcendentals=0,
            bytes_accessed=bytes_accessed,
        ),
    )(x_p, w_p, b2d)

    return out[:M, :N]


# ---------------------------------------------------------------------------
# Demo / self-check
# ---------------------------------------------------------------------------
if __name__ == "__main__":
    key = jax.random.PRNGKey(0)
    kx, kw, kb = jax.random.split(key, 3)

    # Shapes implied by the module: Linear(in_features=1, out_features=1).
    batch, in_features, out_features = 8, 1, 1

    # Deterministic init mimicking torch.nn.Linear's uniform(-1/sqrt(in), 1/sqrt(in)).
    bound = 1.0 / (in_features ** 0.5)
    weight = jax.random.uniform(kw, (out_features, in_features),
                                minval=-bound, maxval=bound, dtype=jnp.float32)
    bias = jax.random.uniform(kb, (out_features,),
                              minval=-bound, maxval=bound, dtype=jnp.float32)
    x = jax.random.normal(kx, (batch, in_features), dtype=jnp.float32)

    y = linear_forward(x, weight, bias)
    jax.block_until_ready(y)

    y_ref = x @ weight.T + bias
    assert y.shape == (batch, out_features)
    assert jnp.allclose(y, y_ref, atol=1e-5, rtol=1e-5)

    # Sanity-check the multi-tile / multi-K accumulator path as well.
    M2, K2, N2 = 640, 1280, 384
    k1, k2, k3 = jax.random.split(jax.random.PRNGKey(1), 3)
    x2 = jax.random.normal(k1, (M2, K2), dtype=jnp.float32)
    w2 = jax.random.normal(k2, (N2, K2), dtype=jnp.float32) * 0.02
    b2 = jax.random.normal(k3, (N2,), dtype=jnp.float32)
    y2 = linear_forward(x2, w2, b2)
    jax.block_until_ready(y2)
    y2_ref = x2 @ w2.T + b2
    assert jnp.allclose(y2, y2_ref, atol=1e-3, rtol=1e-3)

    print("KERNEL_OK")
</pallas_src>

<mosaic_0001>
module attributes {stable_mosaic.version = 11 : i64} {
  func.func @_linear_kernel_single_k(%arg0: i32, %arg1: i32, %arg2: memref<8x128xf32, #tpu.memory_space<vmem>>, %arg3: memref<128x128xf32, #tpu.memory_space<vmem>>, %arg4: memref<1x128xf32, #tpu.memory_space<vmem>>, %arg5: memref<8x128xf32, #tpu.memory_space<vmem>>) attributes {dimension_semantics = [#tpu.dimension_semantics<parallel>, #tpu.dimension_semantics<parallel>], iteration_bounds = array<i64: 1, 1>, scalar_prefetch = 0 : i64, scratch_operands = 0 : i64, tpu.core_type = #tpu.core_type<tc>, window_params = [{transform_indices = @transform_0, window_bounds = array<i64: 8, 128>}, {transform_indices = @transform_1, window_bounds = array<i64: 128, 128>}, {transform_indices = @transform_2, window_bounds = array<i64: 1, 128>}, {transform_indices = @transform_3, window_bounds = array<i64: 8, 128>}]} {
    %c0 = arith.constant 0 : index
    %c0_0 = arith.constant 0 : index
    %0 = vector.load %arg2[%c0, %c0_0] : memref<8x128xf32, #tpu.memory_space<vmem>>, vector<8x128xf32>
    %c0_1 = arith.constant 0 : index
    %c0_2 = arith.constant 0 : index
    %1 = vector.load %arg3[%c0_1, %c0_2] : memref<128x128xf32, #tpu.memory_space<vmem>>, vector<128x128xf32>
    %cst = arith.constant dense<0.000000e+00> : vector<8x128xf32>
    %2 = tpu.matmul %0, %1, %cst {dimension_numbers = #tpu.dot_dimension_numbers<[1], [1], [0], [0], [0, 0, 1, 0], [], []>} : vector<8x128xf32>, vector<128x128xf32>, vector<8x128xf32> -> vector<8x128xf32>
    %c0_3 = arith.constant 0 : index
    %c0_4 = arith.constant 0 : index
    %3 = vector.load %arg4[%c0_3, %c0_4] : memref<1x128xf32, #tpu.memory_space<vmem>>, vector<1x128xf32>
    %4 = vector.broadcast %3 : vector<1x128xf32> to vector<8x128xf32>
    %5 = arith.addf %2, %4 : vector<8x128xf32>
    %c0_5 = arith.constant 0 : index
    %c0_6 = arith.constant 0 : index
    %6 = vector.load %arg5[%c0_5, %c0_6] : memref<8x128xf32, #tpu.memory_space<vmem>>, vector<8x128xf32>
    tpu.vector_store %arg5[%c0_5, %c0_6], %5 {strides = array<i32>} : memref<8x128xf32, #tpu.memory_space<vmem>>, vector<8x128xf32>,
    return
  }
  func.func @transform_0(%arg0: i32, %arg1: i32) -> (i32, i32) {
    %c0_i32 = arith.constant 0 : i32
    %c0_i32_0 = arith.constant 0 : i32
    return %arg0, %c0_i32 : i32, i32
  }
  func.func @transform_1(%arg0: i32, %arg1: i32) -> (i32, i32) {
    %c0_i32 = arith.constant 0 : i32
    %c0_i32_0 = arith.constant 0 : i32
    return %arg1, %c0_i32 : i32, i32
  }
  func.func @transform_2(%arg0: i32, %arg1: i32) -> (i32, i32) {
    %c0_i32 = arith.constant 0 : i32
    %c0_i32_0 = arith.constant 0 : i32
    return %c0_i32, %arg1 : i32, i32
  }
  func.func @transform_3(%arg0: i32, %arg1: i32) -> (i32, i32) {
    %c0_i32 = arith.constant 0 : i32
    return %arg0, %arg1 : i32, i32
  }
}

</mosaic_0001>

<bundles_post_ra>
// kernel: linear_forward.1
= control target key start
LH: loop header
LB: loop body
LE: loop exit
PB: predicated region body
PF: predicated region fallthrough
CT: control target
= control target key end

     0   :  { %v193_v0 = vmov 0.0|0.0   ;;  %vm194_vm0 = vmmov 0   ;;  %v195_v3 = vmov 0.0   ;;  %s273_s1 = inlined_call_operand.vmem [shape: f32[128,128], index: 1, kind: input, shape index: {}]   ;;  %s274_s0 = inlined_call_operand.vmem [shape: f32[8,128], index: 0, kind: input, shape index: {}]   ;;  %s275_s2 = inlined_call_operand.vmem [shape: f32[1,128], index: 2, kind: input, shape index: {}]   ;;  %s276_s3 = inlined_call_operand.vmem [shape: f32[8,128], index: 3, kind: output, shape index: {}]  }
   0x1   :  { %166 = vmatprep.subr.bf16.mxu0 %v193_v0  ;;  %v15_v1 = vld [vmem:[%s273_s1] sm:$0xff]  ;;  %v16_v2 = vld [vmem:[%s273_s1 + $0x8] sm:$0xff]  ;;  %163 = vmatprep.mubr.msk.f32.mxu0 %vm194_vm0, %v195_v3  ;;  %v17_v5 = vld [vmem:[%s273_s1 + $0x10] sm:$0xff] }
   0x2   :  { %v167_v4 = vpack.c.bf16 %v16_v2, %v15_v1  ;;  %v18_v6 = vld [vmem:[%s273_s1 + $0x18] sm:$0xff]  ;;  %v19_v8 = vld [vmem:[%s273_s1 + $0x20] sm:$0xff]  ;;  %v20_v9 = vld [vmem:[%s273_s1 + $0x28] sm:$0xff] }
   0x3   :  { %v170_v7 = vpack.c.bf16 %v18_v6, %v17_v5  ;;  %v173_v10 = vpack.c.bf16 %v20_v9, %v19_v8  ;;  %v21_v11 = vld [vmem:[%s273_s1 + $0x30] sm:$0xff]  ;;  %v22_v12 = vld [vmem:[%s273_s1 + $0x38] sm:$0xff]  ;;  %v23_v14 = vld [vmem:[%s273_s1 + $0x40] sm:$0xff] }
   0x4   :  { %168 = vmatpush3.bf16.xpose.msra.mxu0 %v167_v4  ;;  %v176_v13 = vpack.c.bf16 %v22_v12, %v21_v11  ;;  %v24_v15 = vld [vmem:[%s273_s1 + $0x48] sm:$0xff]  ;;  %v25_v17 = vld [vmem:[%s273_s1 + $0x50] sm:$0xff]  ;;  %v26_v18 = vld [vmem:[%s273_s1 + $0x58] sm:$0xff] }
   0x5   :  { %169 = vmatprep.subr.bf16.mxu0 %v193_v0  ;;  %v179_v16 = vpack.c.bf16 %v24_v15, %v23_v14  ;;  %v182_v19 = vpack.c.bf16 %v26_v18, %v25_v17  ;;  %v27_v20 = vld [vmem:[%s273_s1 + $0x60] sm:$0xff]  ;;  %v28_v21 = vld [vmem:[%s273_s1 + $0x68] sm:$0xff]  ;;  %v29_v23 = vld [vmem:[%s273_s1 + $0x70] sm:$0xff] }
   0x6   :  { %v185_v22 = vpack.c.bf16 %v28_v21, %v27_v20  ;;  %v30_v24 = vld [vmem:[%s273_s1 + $0x78] sm:$0xff]  ;;  %v14_v26 = vld [vmem:[%s274_s0] sm:$0xff] }
   0x7   :  { %v188_v25 = vpack.c.bf16 %v30_v24, %v29_v23  ;;  %v113_v27 = vld [vmem:[%s275_s2] ss:$0 sm:$0xff] }
   0xc   :  { %171 = vmatpush3.bf16.xpose.msra.mxu0 %v170_v7 }
   0xd   :  { %172 = vmatprep.subr.bf16.mxu0 %v193_v0 }
  0x14   :  { %174 = vmatpush3.bf16.xpose.msra.mxu0 %v173_v10 }
  0x15   :  { %175 = vmatprep.subr.bf16.mxu0 %v193_v0 }
  0x1c   :  { %177 = vmatpush3.bf16.xpose.msra.mxu0 %v176_v13 }
  0x1d   :  { %178 = vmatprep.subr.bf16.mxu0 %v193_v0 }
  0x24   :  { %180 = vmatpush3.bf16.xpose.msra.mxu0 %v179_v16 }
  0x25   :  { %181 = vmatprep.subr.bf16.mxu0 %v193_v0 }
  0x2c   :  { %183 = vmatpush3.bf16.xpose.msra.mxu0 %v182_v19 }
  0x2d   :  { %184 = vmatprep.subr.bf16.mxu0 %v193_v0 }
  0x34   :  { %186 = vmatpush3.bf16.xpose.msra.mxu0 %v185_v22 }
  0x35   :  { %187 = vmatprep.subr.bf16.mxu0 %v193_v0 }
  0x3c   :  { %189 = vmatpush3.bf16.xpose.msra.mxu0 %v188_v25 }
  0x43   :  { %164 = vmatmul.mubr.f32.vlgmr.msra.gmra.mrb[0].mxu0 %v14_v26 }
 0x116   :  { %v104_v28 = vpop.f32.mrb[0].mxu0 }
 0x117   :  { %v105_v29 = vadd.f32 %v113_v27, %v104_v28  ;;  %v165_v30 = vpop.f32.mrb[1].mxu0 }
 0x119   :  { %108 = vst [vmem:[%s276_s3] sm:$0xff] %v105_v29 }

</bundles_post_ra>
